<compile_context>
chip_gen: v7x
topology: tpu7x:2x2x1
jax: 0.10.0
libtpu: 0.0.40
codegen_flags: <defaults>
</compile_context>

<pallas_src>
import functools

import jax
import jax.numpy as jnp
from jax import lax
from jax.experimental import pallas as pl
from jax.experimental.pallas import tpu as pltpu


def _round_up(n, m):
    return ((n + m - 1) // m) * m


def _default_vmem_limit():
    # ~75% of the per-core VMEM capacity, leaving headroom for Mosaic-internal
    # scratch (the f32 matmul result + epilogue temps).
    try:
        cap = pltpu.get_tpu_info().vmem_capacity_bytes
    except Exception:
        cap = 64 * 1024 * 1024  # conservative (v7x per-TC) fallback
    return int(cap) * 3 // 4


def _vmem_estimate(tm, H, x_bytes, out_bytes):
    return (H * H * x_bytes            # resident weight (Buffered(1))
            + 3 * H * 4                # bias / gamma / beta (f32, Buffered(1))
            + 3 * tm * H * x_bytes     # x tiles (up to triple-buffered)
            + 2 * tm * H * out_bytes   # output tiles (double-buffered)
            + 2 * tm * H * 4)          # f32 matmul result + epilogue temps


def _head_transform_kernel(x_ref, w_ref, b_ref, g_ref, beta_ref, o_ref, *,
                           eps, valid_rows, approximate_gelu):
    # x_ref: (TM, H)  w_ref: (H, H)  b/g/beta: (1, H) f32  o_ref: (TM, H)
    x = x_ref[...]

    # Zero-mask tail rows of the ragged last block so no garbage reaches
    # erf / rsqrt (output store is masked by Pallas anyway; this is hygiene).
    if valid_rows is not None:
        tm = x.shape[0]
        rows = lax.broadcasted_iota(jnp.int32, x.shape, 0) + pl.program_id(0) * tm
        x = jnp.where(rows < valid_rows, x, jnp.zeros_like(x))

    # MXU matmul in the operands' (possibly bf16) dtype, f32 accumulation.
    h = jnp.dot(x, w_ref[...], preferred_element_type=jnp.float32)
    h = h + b_ref[...]

    if approximate_gelu:
        # tanh form runs on the EUP slot (co-issues with VALU/MXU).
        h = jax.nn.gelu(h, approximate=True)
    else:
        # Exact erf-based GELU (matches torch's default ACT2FN["gelu"]).
        h = 0.5 * h * (1.0 + lax.erf(h * jnp.float32(0.7071067811865476)))

    # LayerNorm over the hidden axis in f32 (two-pass centered form: safe with
    # eps=1e-12; `centered` is reused for the variance so h is traversed once
    # more after the mean reduction, not twice).
    mean = jnp.mean(h, axis=-1, keepdims=True)
    centered = h - mean
    var = jnp.mean(centered * centered, axis=-1, keepdims=True)
    out = centered * lax.rsqrt(var + jnp.float32(eps)) * g_ref[...] + beta_ref[...]

    o_ref[...] = out.astype(o_ref.dtype)


def visual_bert_prediction_head_transform(x, w_t, bias, gamma, beta, *,
                                           eps=1e-12,
                                           row_tile=1024,
                                           mxu_dtype=jnp.bfloat16,
                                           approximate_gelu=False,
                                           vmem_limit_bytes=None):
    """x: (..., H); w_t: (H, H) pre-transposed (in, out); bias/gamma/beta: (H,)."""
    orig_shape = x.shape
    H = orig_shape[-1]
    x2d = x.reshape(-1, H)
    M = x2d.shape[0]
    out_dtype = x.dtype

    # Feed the MXU a narrower dtype (bf16 by default); f32 accumulation and the
    # f32 epilogue preserve BERT-style numerics.  mxu_dtype=None => native dtype.
    if mxu_dtype is not None:
        x2d = x2d.astype(mxu_dtype)
        w_t = w_t.astype(mxu_dtype)

    budget = int(vmem_limit_bytes) if vmem_limit_bytes is not None else _default_vmem_limit()

    # ---- row-tile selection -------------------------------------------------
    if M <= 256:
        # Single full-height block (block dim == full array dim is always legal).
        tm = M
    else:
        # Keep the grid >= 2 so both v7x TensorCores get work; MXU-aligned tm.
        half = _round_up(pl.cdiv(M, 2), 256)
        tm = max(256, min(_round_up(int(row_tile), 256), half))
        xb = x2d.dtype.itemsize
        ob = jnp.dtype(out_dtype).itemsize
        while tm > 256 and _vmem_estimate(tm, H, xb, ob) > budget:
            tm -= 256

    grid = (pl.cdiv(M, tm),)
    valid_rows = M if (M % tm) else None
    x_buffers = 3 if grid[0] >= 3 else 2   # deeper buffering only when usable

    # Small per-channel params pre-cast to f32 once, outside the kernel.
    b2d = bias.astype(jnp.float32).reshape(1, H)
    g2d = gamma.astype(jnp.float32).reshape(1, H)
    beta2d = beta.astype(jnp.float32).reshape(1, H)

    # Constant-across-grid operands: single-buffer them (no second VMEM copy
    # of the (H, H) weight).
    def _const_spec(shape):
        return pl.BlockSpec(shape, lambda i: (0,) * len(shape),
                            pipeline_mode=pl.Buffered(1))

    out = pl.pallas_call(
        functools.partial(_head_transform_kernel, eps=float(eps),
                          valid_rows=valid_rows,
                          approximate_gelu=approximate_gelu),
        out_shape=jax.ShapeDtypeStruct((M, H), out_dtype),
        grid_spec=pltpu.PrefetchScalarGridSpec(
            num_scalar_prefetch=0,
            grid=grid,
            in_specs=[
                pl.BlockSpec((tm, H), lambda i: (i, 0),
                             pipeline_mode=pl.Buffered(x_buffers)),  # x rows
                _const_spec((H, H)),                                 # weight
                _const_spec((1, H)),                                 # bias
                _const_spec((1, H)),                                 # LN gamma
                _const_spec((1, H)),                                 # LN beta
            ],
            out_specs=pl.BlockSpec((tm, H), lambda i: (i, 0)),
        ),
        compiler_params=pltpu.CompilerParams(
            dimension_semantics=("parallel",),
            vmem_limit_bytes=budget,
        ),
    )(x2d, w_t, b2d, g2d, beta2d)

    return out.reshape(orig_shape)


def _reference(x, w_t, bias, gamma, beta, eps=1e-12):
    h = x @ w_t + bias
    h = 0.5 * h * (1.0 + lax.erf(h / jnp.sqrt(2.0)))
    mean = jnp.mean(h, axis=-1, keepdims=True)
    var = jnp.mean((h - mean) ** 2, axis=-1, keepdims=True)
    return (h - mean) * lax.rsqrt(var + eps) * gamma + beta


if __name__ == "__main__":
    key = jax.random.PRNGKey(0)
    eps = 1e-12

    # --- small config consistent with the module: batch=2, seq=8, hidden=32 ---
    batch, seq, hidden = 2, 8, 32
    k_x, k_w, k_b, k_g, k_bt, k_x2 = jax.random.split(key, 6)
    x = jax.random.normal(k_x, (batch, seq, hidden), dtype=jnp.float32)
    # PyTorch Linear weight is (out, in); stored pre-transposed (in, out) here.
    w_t = jax.random.normal(k_w, (hidden, hidden), dtype=jnp.float32) * 0.02
    bias = jax.random.normal(k_b, (hidden,), dtype=jnp.float32) * 0.02
    gamma = 1.0 + 0.1 * jax.random.normal(k_g, (hidden,), dtype=jnp.float32)
    beta = 0.1 * jax.random.normal(k_bt, (hidden,), dtype=jnp.float32)

    # 1) full-precision path vs f32 reference (tight tolerance)
    out_f32 = visual_bert_prediction_head_transform(
        x, w_t, bias, gamma, beta, eps=eps, mxu_dtype=None)
    out_f32 = jax.block_until_ready(out_f32)
    ref_f32 = _reference(x, w_t, bias, gamma, beta, eps=eps)
    assert out_f32.shape == x.shape
    assert jnp.allclose(out_f32, ref_f32, atol=1e-4, rtol=1e-4), "f32 path mismatch"

    # 2) default bf16-MXU path vs a reference fed the same bf16-rounded inputs
    out_bf = visual_bert_prediction_head_transform(x, w_t, bias, gamma, beta, eps=eps)
    out_bf = jax.block_until_ready(out_bf)
    x_bf = x.astype(jnp.bfloat16).astype(jnp.float32)
    w_bf = w_t.astype(jnp.bfloat16).astype(jnp.float32)
    ref_bf = _reference(x_bf, w_bf, bias, gamma, beta, eps=eps)
    assert jnp.allclose(out_bf, ref_bf, atol=2e-3, rtol=2e-3), "bf16 path mismatch"

    # 3) multi-step grid with ragged last block (M=600 -> tm=512, grid=2)
    batch2, seq2, hidden2 = 2, 300, 128
    x3 = jax.random.normal(k_x2, (batch2, seq2, hidden2), dtype=jnp.float32)
    keys = jax.random.split(k_w, 4)
    w3 = jax.random.normal(keys[0], (hidden2, hidden2), dtype=jnp.float32) * 0.02
    b3 = jax.random.normal(keys[1], (hidden2,), dtype=jnp.float32) * 0.02
    g3 = 1.0 + 0.1 * jax.random.normal(keys[2], (hidden2,), dtype=jnp.float32)
    bt3 = 0.1 * jax.random.normal(keys[3], (hidden2,), dtype=jnp.float32)
    out3 = visual_bert_prediction_head_transform(x3, w3, b3, g3, bt3, eps=eps)
    out3 = jax.block_until_ready(out3)
    ref3 = _reference(x3.astype(jnp.bfloat16).astype(jnp.float32),
                      w3.astype(jnp.bfloat16).astype(jnp.float32),
                      b3, g3, bt3, eps=eps)
    assert out3.shape == x3.shape
    assert jnp.allclose(out3, ref3, atol=2e-3, rtol=2e-3), "ragged-grid path mismatch"

    print("KERNEL_OK")
</pallas_src>

<mosaic_0001>
module attributes {stable_mosaic.version = 11 : i64} {
  func.func @_head_transform_kernel(%arg0: i32, %arg1: memref<16x32xf32, #tpu.memory_space<vmem>>, %arg2: memref<32x32xf32, #tpu.memory_space<vmem>>, %arg3: memref<1x32xf32, #tpu.memory_space<vmem>>, %arg4: memref<1x32xf32, #tpu.memory_space<vmem>>, %arg5: memref<1x32xf32, #tpu.memory_space<vmem>>, %arg6: memref<16x32xf32, #tpu.memory_space<vmem>>) attributes {dimension_semantics = [#tpu.dimension_semantics<parallel>], iteration_bounds = array<i64: 1>, scalar_prefetch = 0 : i64, scratch_operands = 0 : i64, tpu.core_type = #tpu.core_type<tc>, window_params = [{pipeline_mode = #tpu.pipeline_mode<double_buffered>, transform_indices = @transform_0, window_bounds = array<i64: 16, 32>}, {pipeline_mode = #tpu.pipeline_mode<synchronous>, transform_indices = @transform_1, window_bounds = array<i64: 32, 32>}, {pipeline_mode = #tpu.pipeline_mode<synchronous>, transform_indices = @transform_2, window_bounds = array<i64: 1, 32>}, {pipeline_mode = #tpu.pipeline_mode<synchronous>, transform_indices = @transform_3, window_bounds = array<i64: 1, 32>}, {pipeline_mode = #tpu.pipeline_mode<synchronous>, transform_indices = @transform_4, window_bounds = array<i64: 1, 32>}, {transform_indices = @transform_5, window_bounds = array<i64: 16, 32>}]} {
    %c0 = arith.constant 0 : index
    %c0_0 = arith.constant 0 : index
    %0 = vector.load %arg1[%c0, %c0_0] : memref<16x32xf32, #tpu.memory_space<vmem>>, vector<16x32xf32>
    %c0_1 = arith.constant 0 : index
    %c0_2 = arith.constant 0 : index
    %1 = vector.load %arg2[%c0_1, %c0_2] : memref<32x32xf32, #tpu.memory_space<vmem>>, vector<32x32xf32>
    %cst = arith.constant dense<0.000000e+00> : vector<16x32xf32>
    %2 = tpu.matmul %0, %1, %cst {dimension_numbers = #tpu.dot_dimension_numbers<[1], [0], [0], [1], [0, 0, 1, 1], [], []>} : vector<16x32xf32>, vector<32x32xf32>, vector<16x32xf32> -> vector<16x32xf32>
    %c0_3 = arith.constant 0 : index
    %c0_4 = arith.constant 0 : index
    %3 = vector.load %arg3[%c0_3, %c0_4] : memref<1x32xf32, #tpu.memory_space<vmem>>, vector<1x32xf32>
    %4 = vector.broadcast %3 : vector<1x32xf32> to vector<16x32xf32>
    %5 = arith.addf %2, %4 : vector<16x32xf32>
    %cst_5 = arith.constant 5.000000e-01 : f32
    %6 = vector.broadcast %cst_5 : f32 to vector<16x32xf32>
    %7 = arith.mulf %6, %5 : vector<16x32xf32>
    %cst_6 = arith.constant 0.707106769 : f32
    %8 = vector.broadcast %cst_6 : f32 to vector<16x32xf32>
    %9 = arith.mulf %5, %8 : vector<16x32xf32>
    %10 = math.erf %9 : vector<16x32xf32>
    %cst_7 = arith.constant 1.000000e+00 : f32
    %11 = vector.broadcast %cst_7 : f32 to vector<16x32xf32>
    %12 = arith.addf %11, %10 : vector<16x32xf32>
    %13 = arith.mulf %7, %12 : vector<16x32xf32>
    %cst_8 = arith.constant dense<0.000000e+00> : vector<16xf32>
    %14 = vector.multi_reduction <add>, %13, %cst_8 [1] : vector<16x32xf32> to vector<16xf32>
    %15 = vector.shape_cast %14 : vector<16xf32> to vector<16x1xf32>
    %cst_9 = arith.constant 3.200000e+01 : f32
    %16 = vector.broadcast %cst_9 : f32 to vector<16x1xf32>
    %17 = arith.divf %15, %16 : vector<16x1xf32>
    %18 = vector.broadcast %17 : vector<16x1xf32> to vector<16x32xf32>
    %19 = arith.subf %13, %18 : vector<16x32xf32>
    %20 = arith.mulf %19, %19 : vector<16x32xf32>
    %cst_10 = arith.constant dense<0.000000e+00> : vector<16xf32>
    %21 = vector.multi_reduction <add>, %20, %cst_10 [1] : vector<16x32xf32> to vector<16xf32>
    %22 = vector.shape_cast %21 : vector<16xf32> to vector<16x1xf32>
    %cst_11 = arith.constant 3.200000e+01 : f32
    %23 = vector.broadcast %cst_11 : f32 to vector<16x1xf32>
    %24 = arith.divf %22, %23 : vector<16x1xf32>
    %cst_12 = arith.constant 9.99999996E-13 : f32
    %25 = vector.broadcast %cst_12 : f32 to vector<16x1xf32>
    %26 = arith.addf %24, %25 : vector<16x1xf32>
    %27 = math.rsqrt %26 : vector<16x1xf32>
    %28 = vector.broadcast %27 : vector<16x1xf32> to vector<16x32xf32>
    %29 = arith.mulf %19, %28 : vector<16x32xf32>
    %c0_13 = arith.constant 0 : index
    %c0_14 = arith.constant 0 : index
    %30 = vector.load %arg4[%c0_13, %c0_14] : memref<1x32xf32, #tpu.memory_space<vmem>>, vector<1x32xf32>
    %31 = vector.broadcast %30 : vector<1x32xf32> to vector<16x32xf32>
    %32 = arith.mulf %29, %31 : vector<16x32xf32>
    %c0_15 = arith.constant 0 : index
    %c0_16 = arith.constant 0 : index
    %33 = vector.load %arg5[%c0_15, %c0_16] : memref<1x32xf32, #tpu.memory_space<vmem>>, vector<1x32xf32>
    %34 = vector.broadcast %33 : vector<1x32xf32> to vector<16x32xf32>
    %35 = arith.addf %32, %34 : vector<16x32xf32>
    %c0_17 = arith.constant 0 : index
    %c0_18 = arith.constant 0 : index
    %36 = vector.load %arg6[%c0_17, %c0_18] : memref<16x32xf32, #tpu.memory_space<vmem>>, vector<16x32xf32>
    tpu.vector_store %arg6[%c0_17, %c0_18], %35 {strides = array<i32>} : memref<16x32xf32, #tpu.memory_space<vmem>>, vector<16x32xf32>,
    return
  }
  func.func @transform_0(%arg0: i32) -> (i32, i32) {
    %c0_i32 = arith.constant 0 : i32
    %c0_i32_0 = arith.constant 0 : i32
    return %arg0, %c0_i32 : i32, i32
  }
  func.func @transform_1(%arg0: i32) -> (i32, i32) {
    %c0_i32 = arith.constant 0 : i32
    %c0_i32_0 = arith.constant 0 : i32
    %c0_i32_1 = arith.constant 0 : i32
    return %c0_i32, %c0_i32_0 : i32, i32
  }
  func.func @transform_2(%arg0: i32) -> (i32, i32) {
    %c0_i32 = arith.constant 0 : i32
    %c0_i32_0 = arith.constant 0 : i32
    %c0_i32_1 = arith.constant 0 : i32
    return %c0_i32, %c0_i32_0 : i32, i32
  }
  func.func @transform_3(%arg0: i32) -> (i32, i32) {
    %c0_i32 = arith.constant 0 : i32
    %c0_i32_0 = arith.constant 0 : i32
    %c0_i32_1 = arith.constant 0 : i32
    return %c0_i32, %c0_i32_0 : i32, i32
  }
  func.func @transform_4(%arg0: i32) -> (i32, i32) {
    %c0_i32 = arith.constant 0 : i32
    %c0_i32_0 = arith.constant 0 : i32
    %c0_i32_1 = arith.constant 0 : i32
    return %c0_i32, %c0_i32_0 : i32, i32
  }
  func.func @transform_5(%arg0: i32) -> (i32, i32) {
    %c0_i32 = arith.constant 0 : i32
    %c0_i32_0 = arith.constant 0 : i32
    return %arg0, %c0_i32 : i32, i32
  }
}

</mosaic_0001>

<bundles_post_ra>
// kernel: tpu_custom_call.1
= control target key start
LH: loop header
LB: loop body
LE: loop exit
PB: predicated region body
PF: predicated region fallthrough
CT: control target
= control target key end

     0   :  { %10 = vsyncpa [#allocation3], 0  ;;  %s431_s0 = inlined_call_operand.hbm [shape: f32[16,32], index: 0, kind: input, shape index: {}]   ;;  %s432_s1 = inlined_call_operand.hbm [shape: f32[32,32], index: 1, kind: input, shape index: {}]   ;;  %s433_s2 = inlined_call_operand.vmem [shape: f32[1,32], index: 2, kind: input, shape index: {}]   ;;  %s434_s3 = inlined_call_operand.vmem [shape: f32[1,32], index: 3, kind: input, shape index: {}]   ;;  %s435_s4 = inlined_call_operand.vmem [shape: f32[1,32], index: 4, kind: input, shape index: {}]   ;;  %s436_s5 = inlined_call_operand.hbm [shape: f32[16,32], index: 5, kind: output, shape index: {}]  }
   0x1   :  { %11 = vsyncpa [#allocation6], 0 }
   0x2   :  { %12 = vsyncpa [#allocation4], 0  ;;  %s334_s18 = smov [#allocation2]   ;;  %s262_s22 = scalar_lea.hbm %s431_s0, 256 }
   0x3   :  { %s18_s19 = sshll.u32 %s334_s18, 4  ;;  %p263_p0 = scmp.ne.s32.totalorder %s431_s0, %s262_s22  ;;  %s19_s19 = int_to_ptr.vmem [resolvable:$true] %s18_s19 }
   0x4   :  { %p266_p1 = scmp.lt.u32.totalorder %s262_s22, %s431_s0 }
   0x6   :  { %p268_p2 = pnand %p266_p1, %p263_p0 }
   0x8   :  { %271 = shalt.err (!%p268_p2)
}
   0x9   :  { %s272_s27 = scalar_lea.vmem %s19_s19, 256  ;;  %p277_p4 = scmp.lt.s32.totalorder %s19_s19, %s19_s19 }
   0xa   :  { %p273_p3 = scmp.ne.s32.totalorder %s19_s19, %s272_s27  ;;  %p278_p5 = scmp.lt.s32.totalorder %s272_s27, %s272_s27 }
   0xc   :  { %p279_p6 = por %p278_p5, %p277_p4 }
   0xe   :  { %p280_p7 = pnand %p279_p6, %p273_p3 }
  0x10   :  { %283 = shalt.err (!%p280_p7)
}
  0x11   :  { %s335_s28 = smov 128   ;;  %s336_s29 = smov 8  }
  0x12   :  { %24 = dma.hbm_to_vmem [thread:$0]  %s431_s0, 256, %s19_s19, [#allocation3], %s335_s28, %s335_s28, %s336_s29  }
  0x13   :  { %s337_s7 = smov [#allocation5]   ;;  %s284_s11 = scalar_lea.hbm %s432_s1, 512 }
  0x14   :  { %s30_s8 = sshll.u32 %s337_s7, 4  ;;  %p285_p8 = scmp.ne.s32.totalorder %s432_s1, %s284_s11  ;;  %s31_s8 = int_to_ptr.vmem [resolvable:$true] %s30_s8 }
  0x15   :  { %p288_p9 = scmp.lt.u32.totalorder %s284_s11, %s432_s1 }
  0x17   :  { %p290_p10 = pnand %p288_p9, %p285_p8 }
  0x19   :  { %293 = shalt.err (!%p290_p10)
}
  0x1a   :  { %s294_s16 = scalar_lea.vmem %s31_s8, 512  ;;  %p299_p12 = scmp.lt.s32.totalorder %s31_s8, %s31_s8 }
  0x1b   :  { %p295_p11 = scmp.ne.s32.totalorder %s31_s8, %s294_s16  ;;  %p300_p13 = scmp.lt.s32.totalorder %s294_s16, %s294_s16 }
  0x1d   :  { %p301_p0 = por %p300_p13, %p299_p12 }
  0x1f   :  { %p302_p1 = pnand %p301_p0, %p295_p11 }
  0x21   :  { %305 = shalt.err (!%p302_p1)
}
  0x22   :  { %36 = dma.hbm_to_vmem [thread:$0]  %s432_s1, 512, %s31_s8, [#allocation6], %s335_s28, %s335_s28, %s336_s29  }
  0x23   :  { %328 = dma.done.wait [#allocation3], 256  }
  0x24   :  { %329 = vsyncadd [#allocation3], 4294967040 }
  0x25   :  { %330 = dma.done.wait [#allocation6], 512  }
  0x26   :  { %331 = vsyncadd [#allocation6], 4294966784  ;;  %vm62_vm0 = vcmask 261120   ;;  %v51_v0 = vld [vmem:[#allocation5] sm:$0xff]  ;;  %v52_v1 = vld [vmem:[#allocation5 + $0x8] sm:$0xff]  ;;  %s338_s22 = smov [#allocation7]  }
  0x27   :  { %v53_v2 = vld [vmem:[#allocation5 + $0x10] sm:$0xff]  ;;  %v241_v3 = vpack.c.bf16 %v52_v1, %v51_v0  ;;  %v54_v4 = vld [vmem:[#allocation5 + $0x18] sm:$0xff]  ;;  %s206_s23 = sshll.u32 %s338_s22, 4  ;;  %s207_s23 = int_to_ptr.vmem [resolvable:$true] %s206_s23 }
  0x28   :  { %v49_v5 = vld [vmem:[#allocation2] sm:$0xff]  ;;  %v245_v6 = vpack.c.bf16 %v54_v4, %v53_v2  ;;  %v50_v7 = vld [vmem:[#allocation2 + $0x8] sm:$0xff]  ;;  %s306_s24 = scalar_lea.vmem %s207_s23, 256  ;;  %p311_p3 = scmp.lt.s32.totalorder %s207_s23, %s207_s23 }
  0x29   :  { %238 = vmatprep.mubr.msk.f32.mxu0 %vm62_vm0, %v49_v5  ;;  %242 = vmatprep.subr.bf16.mxu0 %v241_v3  ;;  %v219_v8 = vld [vmem:[%s433_s2] ss:$0 sm:$0xff]  ;;  %p307_p2 = scmp.ne.s32.totalorder %s207_s23, %s306_s24  ;;  %p312_p4 = scmp.lt.s32.totalorder %s306_s24, %s306_s24 }
  0x2a   :  { %244 = vmatpush3.bf16.msra.mxu0 %v241_v3  ;;  %v222_v42 = vld [vmem:[%s434_s3] ss:$0 sm:$0xff] }
  0x2b   :  { %246 = vmatprep.subr.bf16.mxu0 %v245_v6  ;;  %v223_v44 = vld [vmem:[%s435_s4] ss:$0 sm:$0xff]  ;;  %p313_p5 = por %p312_p4, %p311_p3 }
  0x2d   :  { %p314_p6 = pnand %p313_p5, %p307_p2 }
  0x2e   :  { %248 = vmatpush3.bf16.msra.mxu0 %v245_v6 }
  0x31   :  { %239 = vmatmul.mubr.msk.f32.vlgmr.msra.gmra.mrb[0].mxu0 %vm62_vm0, %v50_v7 }
 0x104   :  { %v240_v9 = vpop.f32.mrb[0].mxu0 }
 0x105   :  { %v141_v10 = vadd.f32 %v240_v9, %v219_v8  ;;  %v135_v11 = vpop.f32.mrb[1].mxu0 }
 0x106   :  { %v136_v12 = vadd.f32 %v219_v8, %v135_v11 }
 0x107   :  { %v147_v13 = vmul.f32 0.70710677, %v141_v10  ;;  %v145_v20 = vmul.f32 0.5, %v141_v10 }
 0x108   :  { %v146_v14 = vmul.f32 0.70710677, %v136_v12  ;;  %v144_v17 = vmul.f32 0.5, %v136_v12 }
 0x109   :  { %254 = verf.f32 %v147_v13 }
 0x10a   :  { %256 = verf.f32 %v146_v14 }
 0x113   :  { %v255_v15 = vpop.eup %254 }
 0x114   :  { %v257_v16 = vpop.eup %256  ;;  %v151_v19 = vadd.f32 1.0, %v255_v15 }
 0x115   :  { %v150_v18 = vadd.f32 1.0, %v257_v16 }
 0x116   :  { %v153_v23 = vmul.f32 %v151_v19, %v145_v20 }
 0x117   :  { %v152_v21 = vmul.f32 %v150_v18, %v144_v17 }
 0x118   :  { %v157_v24 = vsel %vm62_vm0, %v153_v23, 0.0 }
 0x119   :  { %v154_v22 = vsel %vm62_vm0, %v152_v21, 0.0 }
 0x11a   :  { %155 = vadd.xlane.f32.xlu0 %v154_v22 }
 0x11e   :  { %158 = vadd.xlane.f32.xlu0 %v157_v24 }
 0x1a7   :  { %v156_v25 = vpop.xlane.xlu0 %155 }
 0x1a8   :  { %v161_v26 = vmul.f32 0.03125, %v156_v25 }
 0x1aa   :  { %v163_v27 = vsub.f32 %v152_v21, %v161_v26 }
 0x1ab   :  { %v159_v28 = vpop.xlane.xlu0 %158 }
 0x1ac   :  { %v162_v29 = vmul.f32 0.03125, %v159_v28  ;;  %v165_v30 = vmul.f32 %v163_v27, %v163_v27 }
 0x1ae   :  { %v164_v31 = vsub.f32 %v153_v23, %v162_v29  ;;  %v167_v32 = vsel %vm62_vm0, %v165_v30, 0.0 }
 0x1af   :  { %168 = vadd.xlane.f32.xlu1 %v167_v32 }
 0x1b0   :  { %v166_v33 = vmul.f32 %v164_v31, %v164_v31 }
 0x1b2   :  { %v170_v34 = vsel %vm62_vm0, %v166_v33, 0.0 }
 0x1b3   :  { %171 = vadd.xlane.f32.xlu1 %v170_v34 }
 0x23c   :  { %v169_v35 = vpop.xlane.xlu1 %168 }
 0x23d   :  { %v173_v36 = vmul.f32 0.03125, %v169_v35 }
 0x23f   :  { %v175_v37 = vadd.f32 1e-12, %v173_v36 }
 0x240   :  { %v172_v38 = vpop.xlane.xlu1 %171 }
 0x241   :  { %258 = vrsqrt.f32 %v175_v37  ;;  %v174_v39 = vmul.f32 0.03125, %v172_v38 }
 0x243   :  { %v176_v40 = vadd.f32 1e-12, %v174_v39 }
 0x245   :  { %260 = vrsqrt.f32 %v176_v40 }
 0x24b   :  { %v259_v41 = vpop.eup %258 }
 0x24c   :  { %v179_v43 = vmul.f32 %v259_v41, %v163_v27 }
 0x24e   :  { %v188_v45 = vmul.f32 %v222_v42, %v179_v43 }
 0x24f   :  { %v261_v46 = vpop.eup %260 }
 0x250   :  { %v180_v47 = vmul.f32 %v261_v46, %v164_v31  ;;  %v197_v48 = vadd.f32 %v223_v44, %v188_v45 }
 0x252   :  { %v189_v49 = vmul.f32 %v222_v42, %v180_v47  ;;  %199 = vst.msk [vmem:[#allocation7] sm:$0xff] %vm62_vm0, %v197_v48 }
 0x254   :  { %v198_v50 = vadd.f32 %v223_v44, %v189_v49 }
 0x256   :  { %200 = vst.msk [vmem:[#allocation7 + $0x8] sm:$0xff] %vm62_vm0, %v198_v50 }
 0x257   :  { %317 = shalt.err (!%p314_p6)
}
 0x258   :  { %s318_s25 = scalar_lea.hbm %s436_s5, 256 }
 0x259   :  { %p319_p7 = scmp.ne.s32.totalorder %s436_s5, %s318_s25  ;;  %p322_p8 = scmp.lt.u32.totalorder %s318_s25, %s436_s5 }
 0x25b   :  { %p324_p9 = pnand %p322_p8, %p319_p7 }
 0x25d   :  { %327 = shalt.err (!%p324_p9)
}
 0x25e   :  { %212 = dma.vmem_to_hbm [thread:$0]  %s207_s23, 256, %s436_s5, [#allocation4], %s335_s28, %s335_s28, %s336_s29  }
 0x25f   :  { %332 = dma.done.wait [#allocation4], 256  }
 0x260   :  { %333 = vsyncadd [#allocation4], 4294967040 }
 0x261   :  { %216 = vsyncpa [#allocation3], 1 }
 0x262   :  { %217 = vsyncpa [#allocation6], 1 }
 0x263   :  { %218 = vsyncpa [#allocation4], 1 }

</bundles_post_ra>
